<compile_context>
chip_gen: v6e
topology: v6e:2x2x1
jax: 0.10.0
libtpu: 0.0.40
codegen_flags: <defaults>
</compile_context>

<pallas_src>
import jax
import jax.numpy as jnp
from jax.experimental import pallas as pl
from jax.experimental.pallas import tpu as pltpu

_LANE = 128          # lane width: hidden dim padded to this
_SUBLANE = 8         # sublane width: batch padded/tiled in multiples of this
_TB_DEFAULT = 1024   # batch tile (rows); well inside VMEM on v5e/v6e/v7x


def _round_up(n, m):
    return ((n + m - 1) // m) * m


def _pad2d(a, rows, cols):
    """Zero-pad a 2-D array up to (rows, cols)."""
    return jnp.pad(a, ((0, rows - a.shape[0]), (0, cols - a.shape[1])))


def _mlp_kernel(x_ref, w1_ref, b1_ref, w2_ref, b2_ref, w3t_ref, b3_ref, o_ref):
    """One batch tile: (TB, F) -> (TB, n_output)."""
    x = x_ref[...]                                   # (TB, F)   f32
    w1 = w1_ref[...]                                 # (F, Hp)   f32
    n_feature = x.shape[1]

    # ---- Layer 1: K = n_feature (2) is tiny -> VPU broadcast-MAC ----------
    h1 = x[:, 0:1] * w1[0:1, :]
    for f in range(1, n_feature):                    # static, tiny trip count
        h1 = h1 + x[:, f:f + 1] * w1[f:f + 1, :]
    h1 = jnp.maximum(h1 + b1_ref[...], 0.0)          # f32 bias + ReLU

    # ---- Layer 2: (TB, Hp) x (Hp, Hp) on the MXU, bf16 feed, f32 accum ----
    h2 = jnp.dot(h1.astype(w2_ref.dtype), w2_ref[...],
                 preferred_element_type=jnp.float32)
    h2 = jnp.maximum(h2 + b2_ref[...], 0.0)          # f32 bias + ReLU

    # ---- Layer 3: tiny n_output -> f32 VPU mul + XLU lane reduce ----------
    w3t = w3t_ref[...]                               # (n_out, Hp) f32
    n_out = w3t.shape[0]
    cols = [jnp.sum(h2 * w3t[j:j + 1, :], axis=-1, keepdims=True)
            for j in range(n_out)]
    out = cols[0] if n_out == 1 else jnp.concatenate(cols, axis=-1)
    o_ref[...] = (out + b3_ref[...]).astype(o_ref.dtype)   # narrow store


def net_forward(x, params, *, tb=_TB_DEFAULT, mxu_dtype=jnp.bfloat16):
    """x: [B, n_feature] float32.  params: (w1,b1,w2,b2,w3,b3) in
    PyTorch-transposed layout (w: [in, out], b: [1, out])."""
    w1, b1 = params["w1"], params["b1"]
    w2, b2 = params["w2"], params["b2"]
    w3, b3 = params["w3"], params["b3"]

    B, n_feature = x.shape
    n_hidden = w1.shape[1]
    n_output = w3.shape[1]

    # Hidden dim lane-padded to 128 (zero weights + zero biases keep the
    # padded math exact).  The OUTPUT dim is NOT padded anymore.
    hp = _round_up(max(n_hidden, 1), _LANE)
    w1p = _pad2d(w1, n_feature, hp).astype(jnp.float32)      # layer 1: VPU, f32
    b1p = _pad2d(b1, 1, hp).astype(jnp.float32)
    w2p = _pad2d(w2, hp, hp).astype(mxu_dtype)               # layer 2: MXU feed dtype
    b2p = _pad2d(b2, 1, hp).astype(jnp.float32)
    w3tp = _pad2d(w3, hp, n_output).T.astype(jnp.float32)    # (n_output, hp): VPU, f32
    b3p = b3.astype(jnp.float32)                             # (1, n_output)

    x = x.astype(jnp.float32)

    # Batch: pad only to a sublane multiple (8), not to a multiple of tb.
    b_pad = _round_up(max(B, 1), _SUBLANE)
    if b_pad != B:
        x = jnp.pad(x, ((0, b_pad - B), (0, 0)))

    # Batch tile: largest tile up to `tb`, but guarantee >= 2 grid steps when
    # the batch allows, so ("parallel",) can shard across both v7x TensorCores.
    tb = max(_SUBLANE, min(_round_up(tb, _SUBLANE), b_pad))
    if b_pad >= 2 * _SUBLANE:
        tb = min(tb, max(_SUBLANE, (b_pad // 2) // _SUBLANE * _SUBLANE))
    grid = (pl.cdiv(b_pad, tb),)     # ragged last tile handled by Pallas masking

    const = lambda shape: pl.BlockSpec(shape, lambda i: (0, 0))  # weights/biases

    out = pl.pallas_call(
        _mlp_kernel,
        out_shape=jax.ShapeDtypeStruct((b_pad, n_output), jnp.float32),
        grid=grid,
        in_specs=[
            pl.BlockSpec((tb, n_feature), lambda i: (i, 0)),     # x batch tile
            const((n_feature, hp)), const((1, hp)),              # w1, b1
            const((hp, hp)),        const((1, hp)),              # w2, b2
            const((n_output, hp)),  const((1, n_output)),        # w3^T, b3
        ],
        out_specs=pl.BlockSpec((tb, n_output), lambda i: (i, 0)),  # narrow out
        compiler_params=pltpu.CompilerParams(
            dimension_semantics=("parallel",),                   # v7x: 2 TCs
            vmem_limit_bytes=32 * 1024 * 1024,
        ),
    )(x, w1p, b1p, w2p, b2p, w3tp, b3p)

    return out[:B, :]


def init_params(key, n_feature, n_hidden, n_output):
    """Deterministic init mimicking torch.nn.Linear's U(-1/sqrt(fan_in), +) bounds."""
    ks = jax.random.split(key, 6)

    def linear(kw, kb, fan_in, fan_out):
        bound = 1.0 / jnp.sqrt(jnp.float32(fan_in))
        w = jax.random.uniform(kw, (fan_in, fan_out), jnp.float32, -bound, bound)
        b = jax.random.uniform(kb, (1, fan_out), jnp.float32, -bound, bound)
        return w, b

    w1, b1 = linear(ks[0], ks[1], n_feature, n_hidden)
    w2, b2 = linear(ks[2], ks[3], n_hidden, n_hidden)
    w3, b3 = linear(ks[4], ks[5], n_hidden, n_output)
    return {"w1": w1, "b1": b1, "w2": w2, "b2": b2, "w3": w3, "b3": b3}


if __name__ == "__main__":
    key = jax.random.PRNGKey(0)
    k_x, k_p = jax.random.split(key)

    # Mirrors the script: x = cat([x, zeros], dim=1)  ->  n_feature = 2
    batch = 8
    n_feature, n_hidden, n_output = 2, 32, 1

    x_col = jax.random.uniform(k_x, (batch, 1), jnp.float32, -1.0, 1.0)
    x = jnp.concatenate([x_col, jnp.zeros((batch, 1), jnp.float32)], axis=1)

    params = init_params(k_p, n_feature, n_hidden, n_output)

    out = jax.block_until_ready(net_forward(x, params))
    assert out.shape == (batch, n_output)

    # Pure-JAX f32 reference (module semantics).
    h1 = jnp.maximum(x @ params["w1"] + params["b1"], 0.0)
    h2 = jnp.maximum(h1 @ params["w2"] + params["b2"], 0.0)
    ref_f32 = h2 @ params["w3"] + params["b3"]

    # Precision-matched reference (bf16 feed at the layer-2 MXU boundary,
    # f32 elsewhere — exactly what the kernel computes).
    h2m = jnp.dot(h1.astype(jnp.bfloat16), params["w2"].astype(jnp.bfloat16),
                  preferred_element_type=jnp.float32) + params["b2"]
    h2m = jnp.maximum(h2m, 0.0)
    ref_matched = (h2m * params["w3"][:, 0][None, :]).sum(axis=-1, keepdims=True) \
                  + params["b3"]

    assert jnp.allclose(out, ref_matched, atol=1e-3, rtol=1e-3)
    assert jnp.allclose(out, ref_f32, atol=5e-2, rtol=5e-2)

    print("KERNEL_OK")
</pallas_src>

<mosaic_0001>
module attributes {stable_mosaic.version = 11 : i64} {
  func.func @_mlp_kernel(%arg0: i32, %arg1: memref<8x2xf32, #tpu.memory_space<vmem>>, %arg2: memref<2x128xf32, #tpu.memory_space<vmem>>, %arg3: memref<1x128xf32, #tpu.memory_space<vmem>>, %arg4: memref<128x128xbf16, #tpu.memory_space<vmem>>, %arg5: memref<1x128xf32, #tpu.memory_space<vmem>>, %arg6: memref<1x128xf32, #tpu.memory_space<vmem>>, %arg7: memref<1x1xf32, #tpu.memory_space<vmem>>, %arg8: memref<8x1xf32, #tpu.memory_space<vmem>>) attributes {dimension_semantics = [#tpu.dimension_semantics<parallel>], iteration_bounds = array<i64: 1>, scalar_prefetch = 0 : i64, scratch_operands = 0 : i64, tpu.core_type = #tpu.core_type<tc>, window_params = [{transform_indices = @transform_0, window_bounds = array<i64: 8, 2>}, {pipeline_mode = #tpu.pipeline_mode<synchronous>, transform_indices = @transform_1, window_bounds = array<i64: 2, 128>}, {pipeline_mode = #tpu.pipeline_mode<synchronous>, transform_indices = @transform_2, window_bounds = array<i64: 1, 128>}, {pipeline_mode = #tpu.pipeline_mode<synchronous>, transform_indices = @transform_3, window_bounds = array<i64: 128, 128>}, {pipeline_mode = #tpu.pipeline_mode<synchronous>, transform_indices = @transform_4, window_bounds = array<i64: 1, 128>}, {pipeline_mode = #tpu.pipeline_mode<synchronous>, transform_indices = @transform_5, window_bounds = array<i64: 1, 128>}, {pipeline_mode = #tpu.pipeline_mode<synchronous>, transform_indices = @transform_6, window_bounds = array<i64: 1, 1>}, {transform_indices = @transform_7, window_bounds = array<i64: 8, 1>}]} {
    %c0 = arith.constant 0 : index
    %c0_0 = arith.constant 0 : index
    %0 = vector.load %arg1[%c0, %c0_0] : memref<8x2xf32, #tpu.memory_space<vmem>>, vector<8x2xf32>
    %c0_1 = arith.constant 0 : index
    %c0_2 = arith.constant 0 : index
    %1 = vector.load %arg2[%c0_1, %c0_2] : memref<2x128xf32, #tpu.memory_space<vmem>>, vector<2x128xf32>
    %2 = vector.extract_strided_slice %0 {offsets = [0, 0], sizes = [8, 1], strides = [1, 1]} : vector<8x2xf32> to vector<8x1xf32>
    %3 = vector.extract_strided_slice %1 {offsets = [0, 0], sizes = [1, 128], strides = [1, 1]} : vector<2x128xf32> to vector<1x128xf32>
    %4 = vector.broadcast %2 : vector<8x1xf32> to vector<8x128xf32>
    %5 = vector.broadcast %3 : vector<1x128xf32> to vector<8x128xf32>
    %6 = arith.mulf %4, %5 : vector<8x128xf32>
    %7 = vector.extract_strided_slice %0 {offsets = [0, 1], sizes = [8, 1], strides = [1, 1]} : vector<8x2xf32> to vector<8x1xf32>
    %8 = vector.extract_strided_slice %1 {offsets = [1, 0], sizes = [1, 128], strides = [1, 1]} : vector<2x128xf32> to vector<1x128xf32>
    %9 = vector.broadcast %7 : vector<8x1xf32> to vector<8x128xf32>
    %10 = vector.broadcast %8 : vector<1x128xf32> to vector<8x128xf32>
    %11 = arith.mulf %9, %10 : vector<8x128xf32>
    %12 = arith.addf %6, %11 : vector<8x128xf32>
    %c0_3 = arith.constant 0 : index
    %c0_4 = arith.constant 0 : index
    %13 = vector.load %arg3[%c0_3, %c0_4] : memref<1x128xf32, #tpu.memory_space<vmem>>, vector<1x128xf32>
    %14 = vector.broadcast %13 : vector<1x128xf32> to vector<8x128xf32>
    %15 = arith.addf %12, %14 : vector<8x128xf32>
    %cst = arith.constant 0.000000e+00 : f32
    %16 = vector.broadcast %cst : f32 to vector<8x128xf32>
    %17 = arith.maximumf %15, %16 : vector<8x128xf32>
    %18 = arith.truncf %17 : vector<8x128xf32> to vector<8x128xbf16>
    %c0_5 = arith.constant 0 : index
    %c0_6 = arith.constant 0 : index
    %19 = vector.load %arg4[%c0_5, %c0_6] : memref<128x128xbf16, #tpu.memory_space<vmem>>, vector<128x128xbf16>
    %cst_7 = arith.constant dense<0.000000e+00> : vector<8x128xf32>
    %20 = tpu.matmul %18, %19, %cst_7 {dimension_numbers = #tpu.dot_dimension_numbers<[1], [0], [0], [1], [0, 0, 1, 1], [], []>} : vector<8x128xbf16>, vector<128x128xbf16>, vector<8x128xf32> -> vector<8x128xf32>
    %c0_8 = arith.constant 0 : index
    %c0_9 = arith.constant 0 : index
    %21 = vector.load %arg5[%c0_8, %c0_9] : memref<1x128xf32, #tpu.memory_space<vmem>>, vector<1x128xf32>
    %22 = vector.broadcast %21 : vector<1x128xf32> to vector<8x128xf32>
    %23 = arith.addf %20, %22 : vector<8x128xf32>
    %cst_10 = arith.constant 0.000000e+00 : f32
    %24 = vector.broadcast %cst_10 : f32 to vector<8x128xf32>
    %25 = arith.maximumf %23, %24 : vector<8x128xf32>
    %c0_11 = arith.constant 0 : index
    %c0_12 = arith.constant 0 : index
    %26 = vector.load %arg6[%c0_11, %c0_12] : memref<1x128xf32, #tpu.memory_space<vmem>>, vector<1x128xf32>
    %27 = vector.broadcast %26 : vector<1x128xf32> to vector<8x128xf32>
    %28 = arith.mulf %25, %27 : vector<8x128xf32>
    %cst_13 = arith.constant dense<0.000000e+00> : vector<8xf32>
    %29 = vector.multi_reduction <add>, %28, %cst_13 [1] : vector<8x128xf32> to vector<8xf32>
    %30 = vector.shape_cast %29 : vector<8xf32> to vector<8x1xf32>
    %c0_14 = arith.constant 0 : index
    %c0_15 = arith.constant 0 : index
    %31 = vector.load %arg7[%c0_14, %c0_15] : memref<1x1xf32, #tpu.memory_space<vmem>>, vector<1x1xf32>
    %32 = vector.broadcast %31 : vector<1x1xf32> to vector<8x1xf32>
    %33 = arith.addf %30, %32 : vector<8x1xf32>
    %c0_16 = arith.constant 0 : index
    %c0_17 = arith.constant 0 : index
    %34 = vector.load %arg8[%c0_16, %c0_17] : memref<8x1xf32, #tpu.memory_space<vmem>>, vector<8x1xf32>
    tpu.vector_store %arg8[%c0_16, %c0_17], %33 {strides = array<i32>} : memref<8x1xf32, #tpu.memory_space<vmem>>, vector<8x1xf32>,
    return
  }
  func.func @transform_0(%arg0: i32) -> (i32, i32) {
    %c0_i32 = arith.constant 0 : i32
    %c0_i32_0 = arith.constant 0 : i32
    return %arg0, %c0_i32 : i32, i32
  }
  func.func @transform_1(%arg0: i32) -> (i32, i32) {
    %c0_i32 = arith.constant 0 : i32
    %c0_i32_0 = arith.constant 0 : i32
    %c0_i32_1 = arith.constant 0 : i32
    return %c0_i32, %c0_i32_0 : i32, i32
  }
  func.func @transform_2(%arg0: i32) -> (i32, i32) {
    %c0_i32 = arith.constant 0 : i32
    %c0_i32_0 = arith.constant 0 : i32
    %c0_i32_1 = arith.constant 0 : i32
    return %c0_i32, %c0_i32_0 : i32, i32
  }
  func.func @transform_3(%arg0: i32) -> (i32, i32) {
    %c0_i32 = arith.constant 0 : i32
    %c0_i32_0 = arith.constant 0 : i32
    %c0_i32_1 = arith.constant 0 : i32
    return %c0_i32, %c0_i32_0 : i32, i32
  }
  func.func @transform_4(%arg0: i32) -> (i32, i32) {
    %c0_i32 = arith.constant 0 : i32
    %c0_i32_0 = arith.constant 0 : i32
    %c0_i32_1 = arith.constant 0 : i32
    return %c0_i32, %c0_i32_0 : i32, i32
  }
  func.func @transform_5(%arg0: i32) -> (i32, i32) {
    %c0_i32 = arith.constant 0 : i32
    %c0_i32_0 = arith.constant 0 : i32
    %c0_i32_1 = arith.constant 0 : i32
    return %c0_i32, %c0_i32_0 : i32, i32
  }
  func.func @transform_6(%arg0: i32) -> (i32, i32) {
    %c0_i32 = arith.constant 0 : i32
    %c0_i32_0 = arith.constant 0 : i32
    %c0_i32_1 = arith.constant 0 : i32
    return %c0_i32, %c0_i32_0 : i32, i32
  }
  func.func @transform_7(%arg0: i32) -> (i32, i32) {
    %c0_i32 = arith.constant 0 : i32
    %c0_i32_0 = arith.constant 0 : i32
    return %arg0, %c0_i32 : i32, i32
  }
}

</mosaic_0001>

<bundles_post_ra>
// kernel: tpu_custom_call.1
= control target key start
LH: loop header
LB: loop body
LE: loop exit
PB: predicated region body
PF: predicated region fallthrough
CT: control target
= control target key end

     0   :  { %s363_s0 = inlined_call_operand.vmem [shape: f32[8,2], index: 0, kind: input, shape index: {}]   ;;  %s364_s1 = inlined_call_operand.vmem [shape: f32[2,128], index: 1, kind: input, shape index: {}]   ;;  %s365_s2 = inlined_call_operand.vmem [shape: f32[1,128], index: 2, kind: input, shape index: {}]   ;;  %s366_s3 = inlined_call_operand.hbm [shape: bf16[128,128], index: 3, kind: input, shape index: {}]   ;;  %s367_s4 = inlined_call_operand.vmem [shape: f32[1,128], index: 4, kind: input, shape index: {}]   ;;  %s368_s5 = inlined_call_operand.vmem [shape: f32[1,128], index: 5, kind: input, shape index: {}]   ;;  %s369_s6 = inlined_call_operand.<no memory space> [shape: f32[1,1], index: 6, kind: input, shape index: {}]   ;;  %s370_s7 = inlined_call_operand.vmem [shape: f32[8,1], index: 7, kind: output, shape index: {}]  }
   0x1   :  { %v12_v0 = vstv %s369_s6 }
   0x2   :  { %13 = vst [vmem:[#allocation2] sm:$0x1] %v12_v0 }
   0x3   :  { %14 = vsyncpa [#allocation4], 0  ;;  %s292_s26 = smov [#allocation3]  }
   0x4   :  { %s26_s27 = sshll.u32 %s292_s26, 4  ;;  %s27_s27 = int_to_ptr.vmem [resolvable:$true] %s26_s27 }
   0x5   :  { %s278_s28 = scalar_lea.vmem %s27_s27, 1024  ;;  %p283_p1 = scmp.lt.s32.totalorder %s27_s27, %s27_s27 }
   0x6   :  { %p279_p0 = scmp.ne.s32.totalorder %s27_s27, %s278_s28  ;;  %p284_p2 = scmp.lt.s32.totalorder %s278_s28, %s278_s28 }
   0x8   :  { %p285_p3 = por %p284_p2, %p283_p1 }
   0xa   :  { %p286_p4 = pnand %p285_p3, %p279_p0 }
   0xc   :  { %289 = shalt.err (!%p286_p4)
}
   0xd   :  { %s293_s29 = smov 64   ;;  %s294_s30 = smov 4  }
   0xe   :  { %32 = dma.hbm_to_vmem [thread:$0]  %s366_s3, 1024, %s27_s27, [#allocation4], %s293_s29, %s293_s29, %s294_s30  }
   0xf   :  { %290 = dma.done.wait [#allocation4], 1024  }
  0x10   :  { %291 = vsyncadd [#allocation4], 4294966272  ;;  %v295_v1 = vmov 0   ;;  %v296_v2 = vmov 0.0   ;;  %v43_v3 = vld [vmem:[%s363_s0] sm:$0xff]  ;;  %v263_v5 = vld [vmem:[#allocation3 + $0x30] sm:$0xff]   ;;  %v50_v13 = vlaneseq }
  0x11   :  { %260 = vset.pattern.permute.xlu0 %v295_v1  ;;  %233 = vmatprep.subr.bf16.mxu0 %v296_v2  ;;  %v262_v4 = vld [vmem:[#allocation3 + $0x38] sm:$0xff]   ;;  %v297_v6 = vmov 1   ;;  %v264_v7 = vld [vmem:[#allocation3 + $0x28] sm:$0xff]   ;;  %vm298_vm0 = vmmov 0   ;;  %v265_v8 = vld [vmem:[#allocation3 + $0x20] sm:$0xff]   ;;  %vm205_vm1 = vcmask 7168  }
  0x12   :  { %47 = vperm.xlu0 %260, %v43_v3   ;;  %234 = vmatpush3.bf16.msra.mxu0 %v262_v4  ;;  %v266_v9 = vld [vmem:[#allocation3 + $0x18] sm:$0xff]   ;;  %v267_v10 = vld [vmem:[#allocation3 + $0x10] sm:$0xff]   ;;  %v268_v11 = vld [vmem:[#allocation3 + $0x8] sm:$0xff]   ;;  %v51_v14 = vshrl.u32 %v50_v13, 7 }
  0x13   :  { %235 = vmatprep.subr.bf16.mxu0 %v296_v2  ;;  %249 = vmatprep.mubr.msk.bf16.mxu0 %vm298_vm0, %v296_v2  ;;  %v269_v12 = vld [vmem:[#allocation3] sm:$0xff]   ;;  %v212_v24 = vld [vmem:[%s365_s2] ss:$0 sm:$0xff] }
  0x14   :  { %v52_v15 = vsub.s32 0, %v51_v14  ;;  %v61_v16 = vsub.s32 1, %v51_v14  ;;  %v44_v17 = vld [vmem:[%s364_s1] sm:$0x3] }
  0x15   :  { %v213_v29 = vld [vmem:[%s367_s4] ss:$0 sm:$0xff] }
  0x16   :  { %261 = vset.pattern.permute.xlu0 %v297_v6  ;;  %236 = vmatpush3.bf16.msra.mxu0 %v263_v5  ;;  %v53_v19 = vrot.slane %v44_v17, %v52_v15  ;;  %v62_v20 = vrot.slane %v44_v17, %v61_v16  ;;  %v222_v33 = vld [vmem:[%s368_s5] ss:$0 sm:$0xff] }
  0x17   :  { %56 = vperm.xlu0 %261, %v43_v3   ;;  %237 = vmatprep.subr.bf16.mxu0 %v296_v2  ;;  %v223_v38 = vld [vmem:[#allocation2] ss:$0 sm:$0xff] }
  0x1a   :  { %238 = vmatpush3.bf16.msra.mxu0 %v264_v7 }
  0x1b   :  { %239 = vmatprep.subr.bf16.mxu0 %v296_v2 }
  0x1e   :  { %240 = vmatpush3.bf16.msra.mxu0 %v265_v8 }
  0x1f   :  { %241 = vmatprep.subr.bf16.mxu0 %v296_v2 }
  0x22   :  { %242 = vmatpush3.bf16.msra.mxu0 %v266_v9 }
  0x23   :  { %243 = vmatprep.subr.bf16.mxu0 %v296_v2 }
  0x26   :  { %244 = vmatpush3.bf16.msra.mxu0 %v267_v10 }
  0x27   :  { %245 = vmatprep.subr.bf16.mxu0 %v296_v2 }
  0x2a   :  { %246 = vmatpush3.bf16.msra.mxu0 %v268_v11 }
  0x2b   :  { %247 = vmatprep.subr.bf16.mxu0 %v296_v2 }
  0x2e   :  { %248 = vmatpush3.bf16.msra.mxu0 %v269_v12 }
  0x8d   :  { %v48_v18 = vpop.permute.xlu0 %47 }
  0x8e   :  { %v54_v22 = vmul.f32 %v53_v19, %v48_v18 }
  0x92   :  { %v57_v21 = vpop.permute.xlu0 %56 }
  0x93   :  { %v63_v23 = vmul.f32 %v62_v20, %v57_v21 }
  0x95   :  { %v64_v25 = vadd.f32 %v63_v23, %v54_v22 }
  0x97   :  { %v72_v26 = vadd.f32 %v212_v24, %v64_v25 }
  0x99   :  { %v73_v27 = vmax.f32 %v72_v26, 0.0 }
  0x9b   :  { %v74_v28 = vpack.c.bf16 %v73_v27, %v73_v27 }
  0x9d   :  { %250 = vmatmul.mubr.bf16.vlgmr.msra.gmra.mxu0 %v74_v28 }
 0x15d   :  { %v180_v30 = vpop.f32.mrf.mxu0 }
 0x15e   :  { %v181_v31 = vadd.f32 %v213_v29, %v180_v30 }
 0x15f   :  { %v251_v32 = vpop.f32.mrf.mxu0 }
 0x160   :  { %v186_v34 = vmax.f32 %v181_v31, 0.0 }
 0x161   :  { %v183_v35 = vpop.f32.mrf.mxu0 }
 0x162   :  { %v194_v36 = vmul.f32 %v222_v33, %v186_v34 }
 0x163   :  { %v252_v37 = vpop.f32.mrf.mxu0 }
 0x164   :  { %195 = vadd.xlane.f32.xlu1 %v194_v36 }
 0x1ed   :  { %v196_v39 = vpop.xlane.xlu1 %195 }
 0x1ee   :  { %v204_v40 = vadd.f32 %v223_v38, %v196_v39 }
 0x1f0   :  { %206 = vst.msk [vmem:[%s370_s7] sm:$0xff] %vm205_vm1, %v204_v40 }
 0x1f1   :  { %211 = vsyncpa [#allocation4], 1 }

</bundles_post_ra>
